<compile_context>
chip_gen: v6e
topology: v6e:2x2x1
jax: 0.10.0
libtpu: 0.0.40
codegen_flags: <defaults>
</compile_context>

<pallas_src>
import functools

import jax
import jax.numpy as jnp
from jax.experimental import pallas as pl
from jax.experimental.pallas import tpu as pltpu


def _round_up(v, m):
    return ((v + m - 1) // m) * m


def coarse_kernel(x_ref, w1_ref, b1_ref, w2_ref, b2_ref, *out_refs,
                  return_hidden: bool):
    # fc1 + relu.  bf16 MXU operands (cast in-kernel), f32 accumulation.
    x = x_ref[...].astype(jnp.bfloat16)                          # (TB, n1)
    h = jnp.dot(x, w1_ref[...], preferred_element_type=jnp.float32) + b1_ref[...]
    x1 = jnp.maximum(h, 0.0)                                     # (TB, n2) f32

    if return_hidden:
        x1_ref, x2_ref = out_refs
        x1_ref[...] = x1.astype(x1_ref.dtype)
    else:
        (x2_ref,) = out_refs

    # fc2 + numerically stable softmax over the last dim.
    logits = (jnp.dot(x1.astype(jnp.bfloat16), w2_ref[...],
                      preferred_element_type=jnp.float32)
              + b2_ref[...])                                     # (TB, out_size)
    m = jnp.max(logits, axis=-1, keepdims=True)
    e = jnp.exp(logits - m)
    denom = jnp.sum(e, axis=-1, keepdims=True)
    # Exact divide so each row sums to 1 to f32 precision (ZSL scoring /
    # log-prob safe); cost is one extra Newton step over approx reciprocal.
    x2_ref[...] = (e / denom).astype(x2_ref.dtype)


def prepare_params(w1, b1, w2, b2):
    """One-time parameter prep, hoisted out of the per-step path.

    Weights stored in (in, out) layout (PyTorch's (out, in) transposed),
    cast to bf16 for the MXU; biases kept f32 as (1, n) broadcast rows.
    """
    return (w1.astype(jnp.bfloat16),
            b1.astype(jnp.float32).reshape(1, -1),
            w2.astype(jnp.bfloat16),
            b2.astype(jnp.float32).reshape(1, -1))


def coarse_network_forward(x, params, *, tb_max=1024, return_hidden=True,
                           out_dtype=jnp.float32):
    """x: (B, n1) f32; params from prepare_params.

    Returns (x1, x2): x1 = relu(fc1(x)) of shape (B, n2),
                      x2 = softmax(fc2(x1)) of shape (B, out_size).
    If return_hidden=False, returns only x2 (skips the widest HBM writeback).
    """
    w1, b1, w2, b2 = params
    B, n1 = x.shape
    n2 = w1.shape[1]
    out_size = w2.shape[1]

    # Even batch split; force >= 2 tiles for B >= 16 so both v7x TCs get work.
    num_tiles = pl.cdiv(B, tb_max)
    if B >= 16:
        num_tiles = max(num_tiles, 2)
    if num_tiles == 1:
        tb = B                                # full-dim block: legal, zero padding
    else:
        tb = _round_up(pl.cdiv(B, num_tiles), 8)
    grid_b = pl.cdiv(B, tb)
    Bp = grid_b * tb

    # Pad batch rows only when actually needed (never pads feature dims).
    x_in = x if Bp == B else jnp.zeros((Bp, n1), x.dtype).at[:B].set(x)

    # VMEM budget from the actual footprint: double-buffered streamed tiles
    # plus (conservatively double-buffered) resident weights/biases.
    out_bytes = jnp.dtype(out_dtype).itemsize
    streamed = tb * n1 * x_in.dtype.itemsize + tb * (n2 + out_size) * out_bytes
    resident = (w1.size * w1.dtype.itemsize + w2.size * w2.dtype.itemsize
                + (b1.size + b2.size) * 4)
    footprint = 2 * (streamed + resident)
    vmem_limit = int(min(64 * 2**20, max(8 * 2**20, 2 * footprint)))

    out_shape = []
    out_specs = []
    if return_hidden:
        out_shape.append(jax.ShapeDtypeStruct((Bp, n2), out_dtype))
        out_specs.append(pl.BlockSpec((tb, n2), lambda i: (i, 0)))
    out_shape.append(jax.ShapeDtypeStruct((Bp, out_size), out_dtype))
    out_specs.append(pl.BlockSpec((tb, out_size), lambda i: (i, 0)))

    outs = pl.pallas_call(
        functools.partial(coarse_kernel, return_hidden=return_hidden),
        out_shape=tuple(out_shape),
        grid=(grid_b,),
        in_specs=[
            pl.BlockSpec((tb, n1), lambda i: (i, 0)),        # x: streamed per tile
            pl.BlockSpec((n1, n2), lambda i: (0, 0)),        # w1: resident
            pl.BlockSpec((1, n2), lambda i: (0, 0)),         # b1: resident
            pl.BlockSpec((n2, out_size), lambda i: (0, 0)),  # w2: resident
            pl.BlockSpec((1, out_size), lambda i: (0, 0)),   # b2: resident
        ],
        out_specs=tuple(out_specs),
        compiler_params=pltpu.CompilerParams(
            dimension_semantics=("parallel",),   # shard batch tiles across TCs
            vmem_limit_bytes=vmem_limit,
        ),
    )(x_in, w1, b1, w2, b2)

    if return_hidden:
        x1p, x2p = outs
        if Bp != B:
            x1p, x2p = x1p[:B], x2p[:B]
        return x1p, x2p
    (x2p,) = outs
    return x2p[:B] if Bp != B else x2p


def init_params(key, n1, n2, out_size):
    """Deterministic init mimicking nn.Linear default (uniform +/- 1/sqrt(fan_in))."""
    k1, k2, k3, k4 = jax.random.split(key, 4)
    bound1 = 1.0 / (n1 ** 0.5)
    bound2 = 1.0 / (n2 ** 0.5)
    w1 = jax.random.uniform(k1, (n1, n2), jnp.float32, -bound1, bound1)
    b1 = jax.random.uniform(k2, (n2,), jnp.float32, -bound1, bound1)
    w2 = jax.random.uniform(k3, (n2, out_size), jnp.float32, -bound2, bound2)
    b2 = jax.random.uniform(k4, (out_size,), jnp.float32, -bound2, bound2)
    return w1, b1, w2, b2


if __name__ == "__main__":
    B, n1, n2, out_size = 8, 32, 64, 16

    key = jax.random.PRNGKey(0)
    kx, kp = jax.random.split(key)
    x = jax.random.normal(kx, (B, n1), jnp.float32)
    w1, b1, w2, b2 = init_params(kp, n1, n2, out_size)
    params = prepare_params(w1, b1, w2, b2)      # one-time weight prep

    x1, x2 = coarse_network_forward(x, params)
    jax.block_until_ready((x1, x2))

    # Pure-JAX f32 reference. Tolerances loosened for bf16 MXU operands.
    h_ref = jnp.maximum(x @ w1 + b1, 0.0)
    p_ref = jax.nn.softmax(h_ref @ w2 + b2, axis=-1)
    assert x1.shape == (B, n2) and x2.shape == (B, out_size)
    assert jnp.allclose(x1, h_ref, atol=3e-2, rtol=3e-2)
    assert jnp.allclose(x2, p_ref, atol=1e-2, rtol=3e-2)
    assert jnp.allclose(jnp.sum(x2, axis=-1), 1.0, atol=1e-3)

    print("KERNEL_OK")
</pallas_src>

<mosaic_0001>
module attributes {stable_mosaic.version = 11 : i64} {
  func.func @coarse_kernel(%arg0: i32, %arg1: memref<8x32xf32, #tpu.memory_space<vmem>>, %arg2: memref<32x64xbf16, #tpu.memory_space<vmem>>, %arg3: memref<1x64xf32, #tpu.memory_space<vmem>>, %arg4: memref<64x16xbf16, #tpu.memory_space<vmem>>, %arg5: memref<1x16xf32, #tpu.memory_space<vmem>>, %arg6: memref<8x64xf32, #tpu.memory_space<vmem>>, %arg7: memref<8x16xf32, #tpu.memory_space<vmem>>) attributes {dimension_semantics = [#tpu.dimension_semantics<parallel>], iteration_bounds = array<i64: 1>, scalar_prefetch = 0 : i64, scratch_operands = 0 : i64, tpu.core_type = #tpu.core_type<tc>, window_params = [{transform_indices = @transform_0, window_bounds = array<i64: 8, 32>}, {pipeline_mode = #tpu.pipeline_mode<synchronous>, transform_indices = @transform_1, window_bounds = array<i64: 32, 64>}, {pipeline_mode = #tpu.pipeline_mode<synchronous>, transform_indices = @transform_2, window_bounds = array<i64: 1, 64>}, {pipeline_mode = #tpu.pipeline_mode<synchronous>, transform_indices = @transform_3, window_bounds = array<i64: 64, 16>}, {pipeline_mode = #tpu.pipeline_mode<synchronous>, transform_indices = @transform_4, window_bounds = array<i64: 1, 16>}, {transform_indices = @transform_5, window_bounds = array<i64: 8, 64>}, {transform_indices = @transform_6, window_bounds = array<i64: 8, 16>}]} {
    %c0 = arith.constant 0 : index
    %c0_0 = arith.constant 0 : index
    %0 = vector.load %arg1[%c0, %c0_0] : memref<8x32xf32, #tpu.memory_space<vmem>>, vector<8x32xf32>
    %1 = arith.truncf %0 : vector<8x32xf32> to vector<8x32xbf16>
    %c0_1 = arith.constant 0 : index
    %c0_2 = arith.constant 0 : index
    %2 = vector.load %arg2[%c0_1, %c0_2] : memref<32x64xbf16, #tpu.memory_space<vmem>>, vector<32x64xbf16>
    %cst = arith.constant dense<0.000000e+00> : vector<8x64xf32>
    %3 = tpu.matmul %1, %2, %cst {dimension_numbers = #tpu.dot_dimension_numbers<[1], [0], [0], [1], [0, 0, 1, 1], [], []>} : vector<8x32xbf16>, vector<32x64xbf16>, vector<8x64xf32> -> vector<8x64xf32>
    %c0_3 = arith.constant 0 : index
    %c0_4 = arith.constant 0 : index
    %4 = vector.load %arg3[%c0_3, %c0_4] : memref<1x64xf32, #tpu.memory_space<vmem>>, vector<1x64xf32>
    %5 = vector.broadcast %4 : vector<1x64xf32> to vector<8x64xf32>
    %6 = arith.addf %3, %5 : vector<8x64xf32>
    %cst_5 = arith.constant 0.000000e+00 : f32
    %7 = vector.broadcast %cst_5 : f32 to vector<8x64xf32>
    %8 = arith.maximumf %6, %7 : vector<8x64xf32>
    %c0_6 = arith.constant 0 : index
    %c0_7 = arith.constant 0 : index
    %9 = vector.load %arg6[%c0_6, %c0_7] : memref<8x64xf32, #tpu.memory_space<vmem>>, vector<8x64xf32>
    tpu.vector_store %arg6[%c0_6, %c0_7], %8 {strides = array<i32>} : memref<8x64xf32, #tpu.memory_space<vmem>>, vector<8x64xf32>,
    %10 = arith.truncf %8 : vector<8x64xf32> to vector<8x64xbf16>
    %c0_8 = arith.constant 0 : index
    %c0_9 = arith.constant 0 : index
    %11 = vector.load %arg4[%c0_8, %c0_9] : memref<64x16xbf16, #tpu.memory_space<vmem>>, vector<64x16xbf16>
    %cst_10 = arith.constant dense<0.000000e+00> : vector<8x16xf32>
    %12 = tpu.matmul %10, %11, %cst_10 {dimension_numbers = #tpu.dot_dimension_numbers<[1], [0], [0], [1], [0, 0, 1, 1], [], []>} : vector<8x64xbf16>, vector<64x16xbf16>, vector<8x16xf32> -> vector<8x16xf32>
    %c0_11 = arith.constant 0 : index
    %c0_12 = arith.constant 0 : index
    %13 = vector.load %arg5[%c0_11, %c0_12] : memref<1x16xf32, #tpu.memory_space<vmem>>, vector<1x16xf32>
    %14 = vector.broadcast %13 : vector<1x16xf32> to vector<8x16xf32>
    %15 = arith.addf %12, %14 : vector<8x16xf32>
    %cst_13 = arith.constant dense<0xFF800000> : vector<8xf32>
    %16 = vector.multi_reduction <maximumf>, %15, %cst_13 [1] : vector<8x16xf32> to vector<8xf32>
    %17 = vector.shape_cast %16 : vector<8xf32> to vector<8x1xf32>
    %18 = vector.broadcast %17 : vector<8x1xf32> to vector<8x16xf32>
    %19 = arith.subf %15, %18 : vector<8x16xf32>
    %20 = math.exp %19 : vector<8x16xf32>
    %cst_14 = arith.constant dense<0.000000e+00> : vector<8xf32>
    %21 = vector.multi_reduction <add>, %20, %cst_14 [1] : vector<8x16xf32> to vector<8xf32>
    %22 = vector.shape_cast %21 : vector<8xf32> to vector<8x1xf32>
    %23 = vector.broadcast %22 : vector<8x1xf32> to vector<8x16xf32>
    %24 = arith.divf %20, %23 : vector<8x16xf32>
    %c0_15 = arith.constant 0 : index
    %c0_16 = arith.constant 0 : index
    %25 = vector.load %arg7[%c0_15, %c0_16] : memref<8x16xf32, #tpu.memory_space<vmem>>, vector<8x16xf32>
    tpu.vector_store %arg7[%c0_15, %c0_16], %24 {strides = array<i32>} : memref<8x16xf32, #tpu.memory_space<vmem>>, vector<8x16xf32>,
    return
  }
  func.func @transform_0(%arg0: i32) -> (i32, i32) {
    %c0_i32 = arith.constant 0 : i32
    %c0_i32_0 = arith.constant 0 : i32
    return %arg0, %c0_i32 : i32, i32
  }
  func.func @transform_1(%arg0: i32) -> (i32, i32) {
    %c0_i32 = arith.constant 0 : i32
    %c0_i32_0 = arith.constant 0 : i32
    %c0_i32_1 = arith.constant 0 : i32
    return %c0_i32, %c0_i32_0 : i32, i32
  }
  func.func @transform_2(%arg0: i32) -> (i32, i32) {
    %c0_i32 = arith.constant 0 : i32
    %c0_i32_0 = arith.constant 0 : i32
    %c0_i32_1 = arith.constant 0 : i32
    return %c0_i32, %c0_i32_0 : i32, i32
  }
  func.func @transform_3(%arg0: i32) -> (i32, i32) {
    %c0_i32 = arith.constant 0 : i32
    %c0_i32_0 = arith.constant 0 : i32
    %c0_i32_1 = arith.constant 0 : i32
    return %c0_i32, %c0_i32_0 : i32, i32
  }
  func.func @transform_4(%arg0: i32) -> (i32, i32) {
    %c0_i32 = arith.constant 0 : i32
    %c0_i32_0 = arith.constant 0 : i32
    %c0_i32_1 = arith.constant 0 : i32
    return %c0_i32, %c0_i32_0 : i32, i32
  }
  func.func @transform_5(%arg0: i32) -> (i32, i32) {
    %c0_i32 = arith.constant 0 : i32
    %c0_i32_0 = arith.constant 0 : i32
    return %arg0, %c0_i32 : i32, i32
  }
  func.func @transform_6(%arg0: i32) -> (i32, i32) {
    %c0_i32 = arith.constant 0 : i32
    %c0_i32_0 = arith.constant 0 : i32
    return %arg0, %c0_i32 : i32, i32
  }
}

</mosaic_0001>

<bundles_post_ra>
// kernel: tpu_custom_call.1
= control target key start
LH: loop header
LB: loop body
LE: loop exit
PB: predicated region body
PF: predicated region fallthrough
CT: control target
= control target key end

     0   :  { %12 = vsyncpa [#allocation3], 0  ;;  %v317_v1 = vmov 0.0   ;;  %vm318_vm0 = vmmov 0   ;;  %vm50_vm1 = vcmask 261120   ;;  %s392_s0 = inlined_call_operand.vmem [shape: f32[8,32], index: 0, kind: input, shape index: {}]   ;;  %s393_s1 = inlined_call_operand.vmem [shape: bf16[32,64], index: 1, kind: input, shape index: {}]   ;;  %s394_s2 = inlined_call_operand.vmem [shape: f32[1,64], index: 2, kind: input, shape index: {}]   ;;  %s395_s3 = inlined_call_operand.vmem [shape: bf16[64,16], index: 3, kind: input, shape index: {}]   ;;  %s396_s4 = inlined_call_operand.vmem [shape: f32[1,16], index: 4, kind: input, shape index: {}]   ;;  %s397_s5 = inlined_call_operand.hbm [shape: f32[8,64], index: 5, kind: output, shape index: {0}]   ;;  %s398_s6 = inlined_call_operand.hbm [shape: f32[8,16], index: 6, kind: output, shape index: {1}]  }
   0x1   :  { %v263_v0 = vld [vmem:[%s393_s1 + $0x8] sm:$0xff]   ;;  %239 = vmatprep.subr.bf16.mxu0 %v317_v1  ;;  %v264_v2 = vld [vmem:[%s393_s1] sm:$0xff]   ;;  %247 = vmatprep.subr.bf16.mxu1 %v317_v1  ;;  %v265_v4 = vld [vmem:[%s395_s3 + $0x18] sm:$0xff]  }
   0x2   :  { %240 = vmatpush3.bf16.msra.mxu0 %v263_v0  ;;  %243 = vmatprep.mubr.msk.bf16.mxu0 %vm318_vm0, %v317_v1  ;;  %v25_v3 = vld [vmem:[%s392_s0] sm:$0xff]  ;;  %v266_v5 = vld [vmem:[%s395_s3 + $0x10] sm:$0xff]  }
   0x3   :  { %241 = vmatprep.subr.bf16.mxu0 %v317_v1  ;;  %255 = vmatprep.mubr.msk.bf16.mxu1 %vm318_vm0, %v317_v1  ;;  %v26_v6 = vpack.c.bf16 %v25_v3, %v25_v3 }
   0x4   :  { %248 = vmatpush3.bf16.msra.mxu1 %v265_v4 }
   0x5   :  { %249 = vmatprep.subr.bf16.mxu1 %v317_v1 }
   0x6   :  { %242 = vmatpush3.bf16.msra.mxu0 %v264_v2 }
   0x7   :  { %13 = vsyncpa [#allocation5], 0  ;;  %v267_v7 = vld [vmem:[%s395_s3 + $0x8] sm:$0xff]   ;;  %v268_v8 = vld [vmem:[%s395_s3] sm:$0xff]   ;;  %vm95_vm2 = vcmask 523264   ;;  %vm180_vm3 = vcmask 130048  }
   0x8   :  { %250 = vmatpush3.bf16.msra.mxu1 %v266_v5  ;;  %v221_v9 = vld [vmem:[%s394_s2] ss:$0 sm:$0xff]  ;;  %s319_s2 = smov [#allocation2]  }
   0x9   :  { %244 = vmatmul.mubr.msk.bf16.vlgmr.msra.gmra.mxu0 %vm50_vm1, %v26_v6  ;;  %251 = vmatprep.subr.bf16.mxu1 %v317_v1  ;;  %v225_v17 = vld [vmem:[%s396_s4] ss:$0 sm:$0xff]  ;;  %s199_s3 = sshll.u32 %s319_s2, 4  ;;  %s200_s3 = int_to_ptr.vmem [resolvable:$true] %s199_s3 }
   0xa   :  { %s273_s4 = scalar_lea.vmem %s200_s3, 128  ;;  %p278_p1 = scmp.lt.s32.totalorder %s200_s3, %s200_s3 }
   0xb   :  { %p274_p0 = scmp.ne.s32.totalorder %s200_s3, %s273_s4  ;;  %p279_p2 = scmp.lt.s32.totalorder %s273_s4, %s273_s4 }
   0xc   :  { %252 = vmatpush3.bf16.msra.mxu1 %v267_v7 }
   0xd   :  { %253 = vmatprep.subr.bf16.mxu1 %v317_v1  ;;  %p280_p3 = por %p279_p2, %p278_p1 }
   0xf   :  { %p281_p4 = pnand %p280_p3, %p274_p0 }
  0x10   :  { %254 = vmatpush3.bf16.msra.mxu1 %v268_v8 }
  0xc9   :  { %v88_v10 = vpop.f32.mrf.mxu0 }
  0xca   :  { %v89_v11 = vadd.f32 %v221_v9, %v88_v10 }
  0xcb   :  { %v245_v12 = vpop.f32.mrf.mxu0 }
  0xcc   :  { %v94_v13 = vmax.f32 %v89_v11, 0.0 }
  0xcd   :  { %v91_v14 = vpop.f32.mrf.mxu0 }
  0xce   :  { %v97_v15 = vpack.c.bf16 %v94_v13, %v94_v13  ;;  %96 = vst.msk [vmem:[#allocation2] sm:$0xff] %vm95_vm2, %v94_v13 }
  0xcf   :  { %v246_v16 = vpop.f32.mrf.mxu0 }
  0xd0   :  { %256 = vmatmul.mubr.msk.bf16.vlgmr.msra.gmra.mxu1 %vm95_vm2, %v97_v15 }
 0x190   :  { %v174_v18 = vpop.f32.mrf.mxu1 }
 0x191   :  { %v175_v19 = vadd.f32 %v225_v17, %v174_v18 }
 0x192   :  { %v257_v20 = vpop.f32.mrf.mxu1 }
 0x193   :  { %v181_v21 = vsel %vm180_vm3, %v175_v19, -inf }
 0x194   :  { %182 = vmax.xlane.f32.xlu0 %v181_v21  ;;  %v177_v22 = vpop.f32.mrf.mxu1 }
 0x196   :  { %v258_v23 = vpop.f32.mrf.mxu1 }
 0x21d   :  { %v183_v24 = vpop.xlane.xlu0 %182 }
 0x21e   :  { %v184_v25 = vsub.f32 %v175_v19, %v183_v24 }
 0x220   :  { %v185_v26 = vmul.f32 1.442695, %v184_v25 }
 0x222   :  { %269 = vpow2.f32 %v185_v26 }
 0x22f   :  { %v270_v27 = vpop.eup %269 }
 0x230   :  { %v187_v28 = vsel %vm180_vm3, %v270_v27, 0.0 }
 0x231   :  { %188 = vadd.xlane.f32.xlu0 %v187_v28 }
 0x232   :  { %284 = shalt.err (!%p281_p4)
}
 0x233   :  { %202 = dma.vmem_to_hbm [thread:$0]  %s200_s3, 128, %s397_s5, [#allocation3]  }
 0x234   :  { %s320_s15 = smov [#allocation4]  }
 0x235   :  { %s209_s16 = sshll.u32 %s320_s15, 4  ;;  %s210_s16 = int_to_ptr.vmem [resolvable:$true] %s209_s16 }
 0x236   :  { %s293_s17 = scalar_lea.vmem %s210_s16, 128  ;;  %p298_p6 = scmp.lt.s32.totalorder %s210_s16, %s210_s16 }
 0x237   :  { %p294_p5 = scmp.ne.s32.totalorder %s210_s16, %s293_s17  ;;  %p299_p7 = scmp.lt.s32.totalorder %s293_s17, %s293_s17 }
 0x239   :  { %p300_p8 = por %p299_p7, %p298_p6 }
 0x23b   :  { %p301_p9 = pnand %p300_p8, %p294_p5 }
 0x2ba   :  { %v189_v29 = vpop.xlane.xlu0 %188 }
 0x2bb   :  { %271 = vrcp.f32 %v189_v29 }
 0x2c8   :  { %v272_v30 = vpop.eup %271 }
 0x2c9   :  { %v191_v31 = vmul.f32 %v272_v30, %v270_v27 }
 0x2cb   :  { %192 = vst.msk [vmem:[#allocation4] sm:$0xff] %vm180_vm3, %v191_v31 }
 0x2cc   :  { %304 = shalt.err (!%p301_p9)
}
 0x2cd   :  { %212 = dma.vmem_to_hbm [thread:$0]  %s210_s16, 128, %s398_s6, [#allocation5]  }
 0x2ce   :  { %313 = dma.done.wait [#allocation3], 128  }
 0x2cf   :  { %314 = vsyncadd [#allocation3], 4294967168 }
 0x2d0   :  { %315 = dma.done.wait [#allocation5], 128  }
 0x2d1   :  { %316 = vsyncadd [#allocation5], 4294967168 }
 0x2d2   :  { %219 = vsyncpa [#allocation3], 1 }
 0x2d3   :  { %220 = vsyncpa [#allocation5], 1 }

</bundles_post_ra>
